<compile_context>
chip_gen: v5e
topology: v5e:2x2
jax: 0.10.0
libtpu: 0.0.40
codegen_flags: <defaults>
</compile_context>

<pallas_src>
import functools

import jax
import jax.numpy as jnp
from jax.experimental import pallas as pl
from jax.experimental.pallas import tpu as pltpu

LEAKY_SLOPE = 0.01  # nn.LeakyReLU default negative_slope


def _round_up(n, m):
    return ((n + m - 1) // m) * m


def _cdiv(a, b):
    return (a + b - 1) // b


# ------------------------------- kernels ----------------------------------- #

def _fused_kernel(x_ref, w_ref, b_ref, o_ref):
    """out = LeakyReLU(x) @ W_fused + b_fused + x  (single MXU pass, bf16 operands)."""
    x = x_ref[...].astype(jnp.float32)                                # (TM, D)
    a = jnp.where(x >= 0, x, LEAKY_SLOPE * x).astype(jnp.bfloat16)    # VPU elementwise
    out = jnp.dot(a, w_ref[...], preferred_element_type=jnp.float32)  # MXU, f32 acc
    o_ref[...] = (out + b_ref[...] + x).astype(o_ref.dtype)           # residual in f32


def _lowrank_kernel(x_ref, w1_ref, b1_ref, wp_ref, o_ref):
    """Low-rank path (in_dim > 2*latent): two bf16 matmuls, f32 accumulation."""
    x = x_ref[...].astype(jnp.float32)
    a = jnp.where(x >= 0, x, LEAKY_SLOPE * x).astype(jnp.bfloat16)
    h = jnp.dot(a, w1_ref[...], preferred_element_type=jnp.float32) + b1_ref[...]
    out = jnp.dot(h.astype(jnp.bfloat16), wp_ref[...],
                  preferred_element_type=jnp.float32)                 # scale pre-folded
    o_ref[...] = (out + x).astype(o_ref.dtype)


# --------------------------- one-time parameter prep ----------------------- #

def prepare_params(w1_t, b1, wp_t, scale):
    """One-time parameter preparation (call at load time, NOT per forward call).

    w1_t: (in_dim, latent)   = network_beta.linear.weight.T
    b1:   (1, latent)        = network_beta.linear.bias
    wp_t: (latent, out_dim)  = network_beta.projection.weight.T
    scale: python float
    """
    in_dim, latent = w1_t.shape
    out_dim = wp_t.shape[1]
    assert in_dim == out_dim, "in_dim == out_dim -> nearest-downsample branch inactive"
    # TODO(synk): ResMLP's nearest-neighbour downsample branch (in_dim != out_dim,
    # F.interpolate gather) is plain-JAX glue and is not implemented in the kernel.

    D = _round_up(in_dim, 128)
    L = _round_up(latent, 128)
    f32 = jnp.float32
    bf16 = jnp.bfloat16
    s = f32(scale)

    fuse = not (in_dim > 2 * latent)  # fuse unless fusion would increase MXU FLOPs
    if fuse:
        w_f = (w1_t.astype(f32) @ wp_t.astype(f32)) * s               # (in_dim, out_dim)
        b_f = (b1.astype(f32) @ wp_t.astype(f32)) * s                 # (1, out_dim)
        w = jnp.zeros((D, D), bf16).at[:in_dim, :out_dim].set(w_f.astype(bf16))
        b = jnp.zeros((1, D), f32).at[:, :out_dim].set(b_f)
        weights = (w, b)
    else:
        w1 = jnp.zeros((D, L), bf16).at[:in_dim, :latent].set(w1_t.astype(bf16))
        bb = jnp.zeros((1, L), f32).at[:, :latent].set(b1.astype(f32))
        wp = jnp.zeros((L, D), bf16).at[:latent, :out_dim].set(
            (wp_t.astype(f32) * s).astype(bf16))
        weights = (w1, bb, wp)

    return dict(mode="fused" if fuse else "lowrank", weights=weights,
                in_dim=in_dim, out_dim=out_dim, latent=latent, D=D, L=L)


@functools.lru_cache(maxsize=None)
def _chip_config():
    """Returns (vmem_limit_bytes, default_tile_m, two_tensorcores_per_chip)."""
    try:
        cap = int(getattr(pltpu.get_tpu_info(), "vmem_capacity_bytes", 128 << 20))
    except Exception:
        cap = 128 << 20
    if cap <= (64 << 20):   # v7x: 64 MiB per TC, 2 TCs per chip -> leave headroom
        return min(cap - (12 << 20), 52 << 20), 512, True
    # v5e / v6e: 128 MiB physical VMEM, single TC -> bigger tiles, higher limit
    return min(cap - (24 << 20), 104 << 20), 1024, False


# ------------------------------- forward ----------------------------------- #

def disentangled_network_forward(x, params, *, tile_m=None):
    """Forward pass of DisentangledNetwork('beta'). `params` comes from prepare_params()."""
    B, in_dim = x.shape
    assert in_dim == params["in_dim"]
    D, L = params["D"], params["L"]
    itemsize = jnp.dtype(x.dtype).itemsize

    vmem_limit, default_tm, two_tc = _chip_config()
    if tile_m is None:
        tile_m = default_tm

    # Sublane packing of the activation dtype (8 for f32, 16 for bf16, 32 for int8).
    pack = {4: 8, 2: 16, 1: 32}.get(itemsize, 8)
    B8 = _round_up(B, pack)

    # Balanced batch tiles (padding bounded by < pack rows per tile); on v7x make sure
    # there are >= 2 grid steps so the "parallel" axis feeds both TensorCores.
    n_tiles = max(_cdiv(B8, tile_m), 1)
    if two_tc and B8 >= 2 * pack:
        n_tiles = max(n_tiles, 2)
    tm = _round_up(_cdiv(B8, n_tiles), pack)

    # Cap tile so resident weights (double-buffered by default) + double-buffered
    # activation in/out tiles + f32 in-kernel temporaries fit the VMEM budget.
    weight_bytes = sum(int(w.size) * jnp.dtype(w.dtype).itemsize
                       for w in params["weights"])
    per_row_bytes = D * (4 * itemsize + 4 * 4)
    if params["mode"] == "lowrank":
        per_row_bytes += 2 * L * 4
    avail = vmem_limit - 2 * weight_bytes - (4 << 20)
    max_tm = max(pack, (avail // per_row_bytes) // pack * pack)
    tm = min(tm, max_tm)

    Bp = _round_up(B8, tm)
    grid = (Bp // tm,)

    # Fast path: lane/sublane aligned input -> no extra HBM pass for padding.
    if Bp == B and D == in_dim:
        xp = x
    else:
        xp = jnp.zeros((Bp, D), x.dtype).at[:B, :in_dim].set(x)

    x_spec = pl.BlockSpec((tm, D), lambda i: (i, 0))     # tiled over batch, auto-pipelined
    out_spec = pl.BlockSpec((tm, D), lambda i: (i, 0))

    if params["mode"] == "fused":
        kernel = _fused_kernel
        w, b = params["weights"]
        in_specs = [x_spec,
                    pl.BlockSpec((D, D), lambda i: (0, 0)),   # fused weight: VMEM-resident
                    pl.BlockSpec((1, D), lambda i: (0, 0))]   # fused bias:   VMEM-resident
        operands = (xp, w, b)
        flops = 2 * Bp * D * D
    else:
        kernel = _lowrank_kernel
        w1, b1, wp = params["weights"]
        in_specs = [x_spec,
                    pl.BlockSpec((D, L), lambda i: (0, 0)),
                    pl.BlockSpec((1, L), lambda i: (0, 0)),
                    pl.BlockSpec((L, D), lambda i: (0, 0))]
        operands = (xp, w1, b1, wp)
        flops = 2 * Bp * (D * L + L * D)

    bytes_accessed = (int(xp.size) + Bp * D) * itemsize + weight_bytes

    out_padded = pl.pallas_call(
        kernel,
        out_shape=jax.ShapeDtypeStruct((Bp, D), x.dtype),
        grid=grid,
        in_specs=in_specs,
        out_specs=out_spec,
        compiler_params=pltpu.CompilerParams(
            dimension_semantics=("parallel",),        # batch tiles shard across TCs (v7x)
            vmem_limit_bytes=int(vmem_limit)),
        cost_estimate=pl.CostEstimate(
            flops=int(flops), transcendentals=0, bytes_accessed=int(bytes_accessed)),
    )(*operands)

    if Bp == B and D == params["out_dim"]:
        return out_padded                               # fast path: no output slice pass
    return out_padded[:B, :params["out_dim"]]


# ------------------------------ test helpers ------------------------------- #

def init_params(key, in_dim, latent_dim, out_dim, *, zero_projection=True):
    """Parameter init mirroring the module's shapes (projection zero-init per __zero_initial)."""
    k1, k2, k3 = jax.random.split(key, 3)
    bound = 1.0 / jnp.sqrt(jnp.float32(in_dim))
    w1 = jax.random.uniform(k1, (latent_dim, in_dim), jnp.float32, -bound, bound)
    b1 = jax.random.uniform(k2, (latent_dim,), jnp.float32, -bound, bound)
    if zero_projection:
        wp = jnp.zeros((out_dim, latent_dim), jnp.float32)
    else:
        pbound = 1.0 / jnp.sqrt(jnp.float32(latent_dim))
        wp = jax.random.uniform(k3, (out_dim, latent_dim), jnp.float32, -pbound, pbound)
    return w1.T, b1.reshape(1, latent_dim), wp.T   # transposed so forward is x @ W


def reference_forward(x, w1_t, b1, wp_t, scale):
    a = jnp.where(x >= 0, x, LEAKY_SLOPE * x)
    return (a @ w1_t + b1) @ wp_t * scale + x


if __name__ == "__main__":
    key = jax.random.PRNGKey(0)
    kx, kp, kx2, kp2 = jax.random.split(key, 4)

    # (1) fused path: in_dim <= 2*latent, nonzero projection, unaligned feature dims.
    B, in_dim, latent_dim, out_dim = 8, 32, 64, 32
    scale = 1.25
    x = jax.random.normal(kx, (B, in_dim), jnp.float32)
    w1_t, b1, wp_t = init_params(kp, in_dim, latent_dim, out_dim, zero_projection=False)
    params = prepare_params(w1_t, b1, wp_t, scale)
    assert params["mode"] == "fused"
    out = jax.block_until_ready(disentangled_network_forward(x, params))
    ref = reference_forward(x, w1_t, b1, wp_t, scale)
    assert out.shape == (B, out_dim)
    assert jnp.allclose(out, ref, atol=1e-2, rtol=1e-2), float(jnp.max(jnp.abs(out - ref)))

    # (2) faithful-to-module zero-initialized projection: output must equal x.
    w1_t0, b10, wp_t0 = init_params(kp, in_dim, latent_dim, out_dim, zero_projection=True)
    params0 = prepare_params(w1_t0, b10, wp_t0, scale)
    out0 = jax.block_until_ready(disentangled_network_forward(x, params0))
    assert jnp.allclose(out0, x, atol=1e-6, rtol=1e-6)

    # (3) low-rank path: in_dim > 2*latent, already lane/sublane aligned (fast path).
    B2, in2, lat2 = 16, 256, 64
    x2 = jax.random.normal(kx2, (B2, in2), jnp.float32)
    w1_t2, b12, wp_t2 = init_params(kp2, in2, lat2, in2, zero_projection=False)
    params2 = prepare_params(w1_t2, b12, wp_t2, 0.5)
    assert params2["mode"] == "lowrank"
    out2 = jax.block_until_ready(disentangled_network_forward(x2, params2))
    ref2 = reference_forward(x2, w1_t2, b12, wp_t2, 0.5)
    assert out2.shape == (B2, in2)
    assert jnp.allclose(out2, ref2, atol=2e-2, rtol=2e-2), float(jnp.max(jnp.abs(out2 - ref2)))

    print("KERNEL_OK")
</pallas_src>

<mosaic_0001>
module attributes {stable_mosaic.version = 11 : i64} {
  func.func @_fused_kernel(%arg0: i32, %arg1: memref<8x128xf32, #tpu.memory_space<vmem>>, %arg2: memref<128x128xbf16, #tpu.memory_space<vmem>>, %arg3: memref<1x128xf32, #tpu.memory_space<vmem>>, %arg4: memref<8x128xf32, #tpu.memory_space<vmem>>) attributes {dimension_semantics = [#tpu.dimension_semantics<parallel>], iteration_bounds = array<i64: 1>, scalar_prefetch = 0 : i64, scratch_operands = 0 : i64, tpu.core_type = #tpu.core_type<tc>, window_params = [{transform_indices = @transform_0, window_bounds = array<i64: 8, 128>}, {pipeline_mode = #tpu.pipeline_mode<synchronous>, transform_indices = @transform_1, window_bounds = array<i64: 128, 128>}, {pipeline_mode = #tpu.pipeline_mode<synchronous>, transform_indices = @transform_2, window_bounds = array<i64: 1, 128>}, {transform_indices = @transform_3, window_bounds = array<i64: 8, 128>}]} {
    %c0 = arith.constant 0 : index
    %c0_0 = arith.constant 0 : index
    %0 = vector.load %arg1[%c0, %c0_0] : memref<8x128xf32, #tpu.memory_space<vmem>>, vector<8x128xf32>
    %cst = arith.constant 0.000000e+00 : f32
    %1 = vector.broadcast %cst : f32 to vector<8x128xf32>
    %2 = arith.cmpf oge, %0, %1 : vector<8x128xf32>
    %cst_1 = arith.constant 0.00999999977 : f32
    %3 = vector.broadcast %cst_1 : f32 to vector<8x128xf32>
    %4 = arith.mulf %3, %0 : vector<8x128xf32>
    %5 = arith.select %2, %0, %4 : vector<8x128xi1>, vector<8x128xf32>
    %6 = arith.truncf %5 : vector<8x128xf32> to vector<8x128xbf16>
    %c0_2 = arith.constant 0 : index
    %c0_3 = arith.constant 0 : index
    %7 = vector.load %arg2[%c0_2, %c0_3] : memref<128x128xbf16, #tpu.memory_space<vmem>>, vector<128x128xbf16>
    %cst_4 = arith.constant dense<0.000000e+00> : vector<8x128xf32>
    %8 = tpu.matmul %6, %7, %cst_4 {dimension_numbers = #tpu.dot_dimension_numbers<[1], [0], [0], [1], [0, 0, 1, 1], [], []>} : vector<8x128xbf16>, vector<128x128xbf16>, vector<8x128xf32> -> vector<8x128xf32>
    %c0_5 = arith.constant 0 : index
    %c0_6 = arith.constant 0 : index
    %9 = vector.load %arg3[%c0_5, %c0_6] : memref<1x128xf32, #tpu.memory_space<vmem>>, vector<1x128xf32>
    %10 = vector.broadcast %9 : vector<1x128xf32> to vector<8x128xf32>
    %11 = arith.addf %8, %10 : vector<8x128xf32>
    %12 = arith.addf %11, %0 : vector<8x128xf32>
    %c0_7 = arith.constant 0 : index
    %c0_8 = arith.constant 0 : index
    %13 = vector.load %arg4[%c0_7, %c0_8] : memref<8x128xf32, #tpu.memory_space<vmem>>, vector<8x128xf32>
    tpu.vector_store %arg4[%c0_7, %c0_8], %12 {strides = array<i32>} : memref<8x128xf32, #tpu.memory_space<vmem>>, vector<8x128xf32>,
    return
  }
  func.func @transform_0(%arg0: i32) -> (i32, i32) {
    %c0_i32 = arith.constant 0 : i32
    %c0_i32_0 = arith.constant 0 : i32
    return %arg0, %c0_i32 : i32, i32
  }
  func.func @transform_1(%arg0: i32) -> (i32, i32) {
    %c0_i32 = arith.constant 0 : i32
    %c0_i32_0 = arith.constant 0 : i32
    %c0_i32_1 = arith.constant 0 : i32
    return %c0_i32, %c0_i32_0 : i32, i32
  }
  func.func @transform_2(%arg0: i32) -> (i32, i32) {
    %c0_i32 = arith.constant 0 : i32
    %c0_i32_0 = arith.constant 0 : i32
    %c0_i32_1 = arith.constant 0 : i32
    return %c0_i32, %c0_i32_0 : i32, i32
  }
  func.func @transform_3(%arg0: i32) -> (i32, i32) {
    %c0_i32 = arith.constant 0 : i32
    %c0_i32_0 = arith.constant 0 : i32
    return %arg0, %c0_i32 : i32, i32
  }
}

</mosaic_0001>

<bundles_post_ra>
// kernel: tpu_custom_call.1
= control target key start
LH: loop header
LB: loop body
LE: loop exit
PB: predicated region body
PF: predicated region fallthrough
CT: control target
= control target key end

     0   :  { %8 = vsyncpa [#allocation3], 0  ;;  %s312_s0 = inlined_call_operand.hbm [shape: f32[8,128], index: 0, kind: input, shape index: {}]   ;;  %s313_s1 = inlined_call_operand.hbm [shape: bf16[128,128], index: 1, kind: input, shape index: {}]   ;;  %s314_s2 = inlined_call_operand.vmem [shape: f32[1,128], index: 2, kind: input, shape index: {}]   ;;  %s315_s3 = inlined_call_operand.hbm [shape: f32[8,128], index: 3, kind: output, shape index: {}]  }
   0x1   :  { %9 = vsyncpa [#allocation6], 0 }
   0x2   :  { %10 = vsyncpa [#allocation4], 0  ;;  %s16_s14 = sshll.u32 %s312_s0, 4  ;;  %s275_s15 = smov [#allocation2]   ;;  %s17_s14 = int_to_ptr.hbm [resolvable:$true] %s16_s14 }
   0x3   :  { %s18_s16 = sshll.u32 %s275_s15, 4  ;;  %s26_s19 = sshll.u32 %s313_s1, 4  ;;  %s19_s16 = int_to_ptr.vmem [resolvable:$true] %s18_s16  ;;  %s27_s19 = int_to_ptr.hbm [resolvable:$true] %s26_s19 }
   0x4   :  { %21 = dma.hbm_to_vmem [thread:$0]  %s17_s14, 128, %s19_s16, [#allocation3]  }
   0x5   :  { %s276_s20 = smov [#allocation5]   ;;  %s277_s22 = smov 64  }
   0x6   :  { %s28_s21 = sshll.u32 %s276_s20, 4  ;;  %s278_s23 = smov 4   ;;  %s29_s21 = int_to_ptr.vmem [resolvable:$true] %s28_s21 }
   0x7   :  { %34 = dma.hbm_to_vmem [thread:$0]  %s27_s19, 1024, %s29_s21, [#allocation6], %s277_s22, %s277_s22, %s278_s23  }
   0x8   :  { %269 = dma.done.wait [#allocation3], 128  }
   0x9   :  { %270 = vsyncadd [#allocation3], 4294967168 }
   0xa   :  { %271 = dma.done.wait [#allocation6], 1024  }
   0xb   :  { %272 = vsyncadd [#allocation6], 4294966272  ;;  %v190_v0 = vld [vmem:[#allocation5 + $0x38] sm:$0xff]  ;;  %v189_v1 = vld [vmem:[#allocation5 + $0x30] sm:$0xff]  ;;  %s279_s24 = smov [#allocation7]   ;;  %s140_s28 = sshll.u32 %s315_s3, 4  ;;  %s141_s28 = int_to_ptr.hbm [resolvable:$true] %s140_s28 }
   0xc   :  { %118 = vmatpush.bf16.msra.mxu0 %v190_v0  ;;  %v188_v2 = vld [vmem:[#allocation5 + $0x28] sm:$0xff]  ;;  %v187_v3 = vld [vmem:[#allocation5 + $0x20] sm:$0xff]  ;;  %v186_v4 = vld [vmem:[#allocation5 + $0x18] sm:$0xff]  ;;  %s138_s25 = sshll.u32 %s279_s24, 4  ;;  %s139_s25 = int_to_ptr.vmem [resolvable:$true] %s138_s25 }
   0xd   :  { %v185_v5 = vld [vmem:[#allocation5 + $0x10] sm:$0xff]  ;;  %v45_v6 = vld [vmem:[#allocation2] sm:$0xff]  ;;  %v184_v7 = vld [vmem:[#allocation5 + $0x8] sm:$0xff] }
   0xe   :  { %v47_v8 = vmul.f32 0.01, %v45_v6  ;;  %vm46_vm0 = vcmp.ge.f32.partialorder %v45_v6, 0.0  ;;  %v183_v9 = vld [vmem:[#allocation5] sm:$0xff]  ;;  %v196_v12 = vld [vmem:[%s314_s2] ss:$0 sm:$0xff] }
  0x10   :  { %119 = vmatpush.bf16.msra.mxu0 %v189_v1  ;;  %v48_v10 = vsel %vm46_vm0, %v45_v6, %v47_v8 }
  0x11   :  { %v49_v11 = vpack.c.bf16 %v48_v10, %v48_v10 }
  0x14   :  { %120 = vmatpush.bf16.msra.mxu0 %v188_v2 }
  0x18   :  { %121 = vmatpush.bf16.msra.mxu0 %v187_v3 }
  0x1c   :  { %122 = vmatpush.bf16.msra.mxu0 %v186_v4 }
  0x20   :  { %123 = vmatpush.bf16.msra.mxu0 %v185_v5 }
  0x24   :  { %124 = vmatpush.bf16.msra.mxu0 %v184_v7 }
  0x28   :  { %125 = vmatpush.bf16.msra.mxu0 %v183_v9 }
  0x2b   :  { %126 = vmatmul.bf16.vlgmr.msra.gmra.mxu0 %v49_v11 }
  0xa8   :  { %v127_v13 = vpop.f32.mrf.mxu0 }
  0xa9   :  { %v128_v14 = vadd.f32 %v196_v12, %v127_v13 }
  0xab   :  { %v131_v15 = vadd.f32 %v128_v14, %v45_v6 }
  0xad   :  { %132 = vst [vmem:[#allocation7] sm:$0xff] %v131_v15 }
  0xae   :  { %143 = dma.vmem_to_hbm [thread:$0]  %s139_s25, 128, %s141_s28, [#allocation4]  }
  0xb0   :  { %v129_v16 = vpop.f32.mrf.mxu0 }
  0xb1   :  { %273 = dma.done.wait [#allocation4], 128  }
  0xb2   :  { %274 = vsyncadd [#allocation4], 4294967168 }
  0xb3   :  { %148 = vsyncpa [#allocation3], 1 }
  0xb4   :  { %149 = vsyncpa [#allocation6], 1 }
  0xb5   :  { %150 = vsyncpa [#allocation4], 1 }

</bundles_post_ra>
